<compile_context>
chip_gen: v7x
topology: tpu7x:2x2x1
jax: 0.10.0
libtpu: 0.0.40
codegen_flags: <defaults>
</compile_context>

<pallas_src>
import jax
import jax.numpy as jnp
from jax.experimental import pallas as pl
from jax.experimental.pallas import tpu as pltpu


# --------------------------------------------------------------------------
# Kernels (one per phase so the eval hot path carries zero drop-path cost).
# --------------------------------------------------------------------------
def _residual_mlp_kernel(x_ref, w1_ref, b1_ref, w2_ref, b2_ref, o_ref):
    # x_ref: (TM, C); w1/w2: bf16 (VMEM-resident); b1/b2: f32.
    x = x_ref[...]
    # First matmul on the MXU: bf16 operands, f32 accumulation.
    h = jnp.dot(x.astype(jnp.bfloat16), w1_ref[...],
                preferred_element_type=jnp.float32) + b1_ref[...]
    # Hardswish in f32 on the VPU: x * relu6(x + 3) / 6
    h = h * jnp.clip(h + 3.0, 0.0, 6.0) * (1.0 / 6.0)
    # Second matmul, again bf16 operands / f32 accumulate.
    y = jnp.dot(h.astype(jnp.bfloat16), w2_ref[...],
                preferred_element_type=jnp.float32) + b2_ref[...]
    # Residual add in f32, cast only at the store.
    o_ref[...] = (x.astype(jnp.float32) + y).astype(o_ref.dtype)


def _residual_mlp_droppath_kernel(x_ref, s_ref, w1_ref, b1_ref, w2_ref, b2_ref,
                                  o_ref):
    # Training variant: s_ref is the per-row (TM, 1) stochastic-depth scale.
    x = x_ref[...]
    h = jnp.dot(x.astype(jnp.bfloat16), w1_ref[...],
                preferred_element_type=jnp.float32) + b1_ref[...]
    h = h * jnp.clip(h + 3.0, 0.0, 6.0) * (1.0 / 6.0)
    y = jnp.dot(h.astype(jnp.bfloat16), w2_ref[...],
                preferred_element_type=jnp.float32) + b2_ref[...]
    o_ref[...] = (x.astype(jnp.float32) + y * s_ref[...]).astype(o_ref.dtype)


# --------------------------------------------------------------------------
# Wrapper
# --------------------------------------------------------------------------
def _round_up(a, b):
    return ((a + b - 1) // b) * b


def prepare_params(w1, b1, w2, b2):
    """One-time (model init) parameter prep: bf16 weights for the MXU,
    2-D f32 biases for the f32 epilogue.  Hoisted out of the forward call so
    the per-call HBM read/write of the f32 weights disappears."""
    return dict(
        w1=w1.astype(jnp.bfloat16),
        b1=b1.reshape(1, -1).astype(jnp.float32),
        w2=w2.astype(jnp.bfloat16),
        b2=b2.reshape(1, -1).astype(jnp.float32),
    )


def residual_forward(x, params, *, drop=0.0, training=False, key=None,
                     tile_m=1024):
    """out = x + m(x) [* stochastic-depth mask].  x: (B, N, C)."""
    B, N, C = x.shape
    H = params["w1"].shape[1]
    M = B * N

    # Tile policy: as large as the sweepable tile_m allows (HBM-bound kernel),
    # but never fewer than 2 grid steps (so a v7x megacore can split the
    # "parallel" axis across both TensorCores), and a multiple of 8 sublanes.
    tm = _round_up(max(8, min(tile_m, pl.cdiv(M, 2))), 8)
    n_tiles = pl.cdiv(M, tm)

    # Flatten (B, N) -> M rows; no padding — Pallas masks the partial last
    # block (rows are independent, OOB stores are dropped).
    x2 = x.reshape(M, C)

    use_drop = bool(training) and drop > 0
    if use_drop:
        assert key is not None, "training drop-path needs a PRNG key"
        # Same semantics as torch.rand(B,1,1).ge_(drop).div(1-drop)
        u = jax.random.uniform(key, (B, 1, 1), dtype=jnp.float32)
        scale_b = (u >= drop).astype(jnp.float32) / (1.0 - drop)
        scale_rows = jnp.broadcast_to(scale_b, (B, N, 1)).reshape(M, 1)

    x_spec = pl.BlockSpec((tm, C), lambda i: (i, 0))       # streams per tile
    out_spec = pl.BlockSpec((tm, C), lambda i: (i, 0))
    # Weights/biases: constant index_map -> fetched once, VMEM-resident across
    # all grid steps.  (For v7x with wide production stages, these can be
    # single-buffered via pipeline_mode=pl.Buffered(1) to reclaim VMEM.)
    w1_spec = pl.BlockSpec((C, H), lambda i: (0, 0))
    b1_spec = pl.BlockSpec((1, H), lambda i: (0, 0))
    w2_spec = pl.BlockSpec((H, C), lambda i: (0, 0))
    b2_spec = pl.BlockSpec((1, C), lambda i: (0, 0))

    compiler_params = pltpu.CompilerParams(
        dimension_semantics=("parallel",),
        # Above v5e's 16 MiB / v6e-v7x's 32 MiB scoped defaults, below v7x's
        # 64 MiB physical — keeps full 2-deep pipelining at large tiles.
        vmem_limit_bytes=48 * 1024 * 1024,
    )

    if use_drop:
        kernel = _residual_mlp_droppath_kernel
        in_specs = [x_spec,
                    pl.BlockSpec((tm, 1), lambda i: (i, 0)),   # per-row scale
                    w1_spec, b1_spec, w2_spec, b2_spec]
        args = (x2, scale_rows,
                params["w1"], params["b1"], params["w2"], params["b2"])
    else:
        kernel = _residual_mlp_kernel
        in_specs = [x_spec, w1_spec, b1_spec, w2_spec, b2_spec]
        args = (x2, params["w1"], params["b1"], params["w2"], params["b2"])

    out2 = pl.pallas_call(
        kernel,
        out_shape=jax.ShapeDtypeStruct((M, C), x.dtype),
        grid_spec=pltpu.PrefetchScalarGridSpec(
            num_scalar_prefetch=0,
            grid=(n_tiles,),
            in_specs=in_specs,
            out_specs=out_spec,
        ),
        compiler_params=compiler_params,
    )(*args)

    return out2.reshape(B, N, C)


# --------------------------------------------------------------------------
# Reference + demo
# --------------------------------------------------------------------------
def _reference_f32(x, w1, b1, w2, b2):
    h = x @ w1 + b1
    h = h * jnp.clip(h + 3.0, 0.0, 6.0) / 6.0
    return x + (h @ w2 + b2)


if __name__ == "__main__":
    # LeViT-like stage: 14x14 = 196 tokens, C = 128 (lane-dense), hidden = 2C.
    # M = 2*196 = 392 deliberately does NOT divide the tile so the masked
    # partial-last-block path (no wrapper padding/slicing) is exercised.
    B, N, C, Hdim = 2, 196, 128, 256

    key = jax.random.PRNGKey(0)
    kx, k1, k2, k3, k4 = jax.random.split(key, 5)

    x = jax.random.normal(kx, (B, N, C), dtype=jnp.float32)
    w1 = jax.random.normal(k1, (C, Hdim), dtype=jnp.float32) * 0.05
    b1 = jax.random.normal(k2, (Hdim,), dtype=jnp.float32) * 0.01
    w2 = jax.random.normal(k3, (Hdim, C), dtype=jnp.float32) * 0.05
    b2 = jax.random.normal(k4, (C,), dtype=jnp.float32) * 0.01

    params = prepare_params(w1, b1, w2, b2)   # one-time init cost

    # Eval-mode path (drop inactive): out = x + m(x)
    out = residual_forward(x, params, drop=0.1, training=False)
    out = jax.block_until_ready(out)

    # Loose tolerance vs. the f32 reference: kernel uses bf16 matmul operands
    # with f32 accumulation.
    ref = _reference_f32(x, w1, b1, w2, b2)
    assert out.shape == ref.shape
    assert jnp.allclose(out, ref, atol=5e-2, rtol=5e-2), "mismatch vs reference"

    # Training-mode path (per-sample stochastic-depth mask): exercise once.
    out_train = residual_forward(x, params, drop=0.25, training=True,
                                 key=jax.random.PRNGKey(42))
    jax.block_until_ready(out_train)

    print("KERNEL_OK")
</pallas_src>

<mosaic_0001>
module attributes {stable_mosaic.version = 11 : i64} {
  func.func @_residual_mlp_kernel(%arg0: i32, %arg1: memref<200x128xf32, #tpu.memory_space<vmem>>, %arg2: memref<128x256xbf16, #tpu.memory_space<vmem>>, %arg3: memref<1x256xf32, #tpu.memory_space<vmem>>, %arg4: memref<256x128xbf16, #tpu.memory_space<vmem>>, %arg5: memref<1x128xf32, #tpu.memory_space<vmem>>, %arg6: memref<200x128xf32, #tpu.memory_space<vmem>>) attributes {dimension_semantics = [#tpu.dimension_semantics<parallel>], iteration_bounds = array<i64: 2>, scalar_prefetch = 0 : i64, scratch_operands = 0 : i64, tpu.core_type = #tpu.core_type<tc>, window_params = [{transform_indices = @transform_0, window_bounds = array<i64: 200, 128>}, {pipeline_mode = #tpu.pipeline_mode<synchronous>, transform_indices = @transform_1, window_bounds = array<i64: 128, 256>}, {pipeline_mode = #tpu.pipeline_mode<synchronous>, transform_indices = @transform_2, window_bounds = array<i64: 1, 256>}, {pipeline_mode = #tpu.pipeline_mode<synchronous>, transform_indices = @transform_3, window_bounds = array<i64: 256, 128>}, {pipeline_mode = #tpu.pipeline_mode<synchronous>, transform_indices = @transform_4, window_bounds = array<i64: 1, 128>}, {transform_indices = @transform_5, window_bounds = array<i64: 200, 128>}]} {
    %c0 = arith.constant 0 : index
    %c0_0 = arith.constant 0 : index
    %0 = vector.load %arg1[%c0, %c0_0] : memref<200x128xf32, #tpu.memory_space<vmem>>, vector<200x128xf32>
    %1 = arith.truncf %0 : vector<200x128xf32> to vector<200x128xbf16>
    %c0_1 = arith.constant 0 : index
    %c0_2 = arith.constant 0 : index
    %2 = vector.load %arg2[%c0_1, %c0_2] : memref<128x256xbf16, #tpu.memory_space<vmem>>, vector<128x256xbf16>
    %cst = arith.constant dense<0.000000e+00> : vector<200x256xf32>
    %3 = tpu.matmul %1, %2, %cst {dimension_numbers = #tpu.dot_dimension_numbers<[1], [0], [0], [1], [0, 0, 1, 1], [], []>} : vector<200x128xbf16>, vector<128x256xbf16>, vector<200x256xf32> -> vector<200x256xf32>
    %c0_3 = arith.constant 0 : index
    %c0_4 = arith.constant 0 : index
    %4 = vector.load %arg3[%c0_3, %c0_4] : memref<1x256xf32, #tpu.memory_space<vmem>>, vector<1x256xf32>
    %5 = vector.broadcast %4 : vector<1x256xf32> to vector<200x256xf32>
    %6 = arith.addf %3, %5 : vector<200x256xf32>
    %cst_5 = arith.constant 3.000000e+00 : f32
    %7 = vector.broadcast %cst_5 : f32 to vector<200x256xf32>
    %8 = arith.addf %6, %7 : vector<200x256xf32>
    %cst_6 = arith.constant 0.000000e+00 : f32
    %cst_7 = arith.constant 6.000000e+00 : f32
    %9 = vector.broadcast %cst_6 : f32 to vector<200x256xf32>
    %10 = arith.maximumf %9, %8 : vector<200x256xf32>
    %11 = vector.broadcast %cst_7 : f32 to vector<200x256xf32>
    %12 = arith.minimumf %11, %10 : vector<200x256xf32>
    %13 = arith.mulf %6, %12 : vector<200x256xf32>
    %cst_8 = arith.constant 0.166666672 : f32
    %14 = vector.broadcast %cst_8 : f32 to vector<200x256xf32>
    %15 = arith.mulf %13, %14 : vector<200x256xf32>
    %16 = arith.truncf %15 : vector<200x256xf32> to vector<200x256xbf16>
    %c0_9 = arith.constant 0 : index
    %c0_10 = arith.constant 0 : index
    %17 = vector.load %arg4[%c0_9, %c0_10] : memref<256x128xbf16, #tpu.memory_space<vmem>>, vector<256x128xbf16>
    %cst_11 = arith.constant dense<0.000000e+00> : vector<200x128xf32>
    %18 = tpu.matmul %16, %17, %cst_11 {dimension_numbers = #tpu.dot_dimension_numbers<[1], [0], [0], [1], [0, 0, 1, 1], [], []>} : vector<200x256xbf16>, vector<256x128xbf16>, vector<200x128xf32> -> vector<200x128xf32>
    %c0_12 = arith.constant 0 : index
    %c0_13 = arith.constant 0 : index
    %19 = vector.load %arg5[%c0_12, %c0_13] : memref<1x128xf32, #tpu.memory_space<vmem>>, vector<1x128xf32>
    %20 = vector.broadcast %19 : vector<1x128xf32> to vector<200x128xf32>
    %21 = arith.addf %18, %20 : vector<200x128xf32>
    %22 = arith.addf %0, %21 : vector<200x128xf32>
    %c0_14 = arith.constant 0 : index
    %c0_15 = arith.constant 0 : index
    %23 = vector.load %arg6[%c0_14, %c0_15] : memref<200x128xf32, #tpu.memory_space<vmem>>, vector<200x128xf32>
    tpu.vector_store %arg6[%c0_14, %c0_15], %22 {strides = array<i32>} : memref<200x128xf32, #tpu.memory_space<vmem>>, vector<200x128xf32>,
    return
  }
  func.func @transform_0(%arg0: i32) -> (i32, i32) {
    %c0_i32 = arith.constant 0 : i32
    %c0_i32_0 = arith.constant 0 : i32
    return %arg0, %c0_i32 : i32, i32
  }
  func.func @transform_1(%arg0: i32) -> (i32, i32) {
    %c0_i32 = arith.constant 0 : i32
    %c0_i32_0 = arith.constant 0 : i32
    %c0_i32_1 = arith.constant 0 : i32
    return %c0_i32, %c0_i32_0 : i32, i32
  }
  func.func @transform_2(%arg0: i32) -> (i32, i32) {
    %c0_i32 = arith.constant 0 : i32
    %c0_i32_0 = arith.constant 0 : i32
    %c0_i32_1 = arith.constant 0 : i32
    return %c0_i32, %c0_i32_0 : i32, i32
  }
  func.func @transform_3(%arg0: i32) -> (i32, i32) {
    %c0_i32 = arith.constant 0 : i32
    %c0_i32_0 = arith.constant 0 : i32
    %c0_i32_1 = arith.constant 0 : i32
    return %c0_i32, %c0_i32_0 : i32, i32
  }
  func.func @transform_4(%arg0: i32) -> (i32, i32) {
    %c0_i32 = arith.constant 0 : i32
    %c0_i32_0 = arith.constant 0 : i32
    %c0_i32_1 = arith.constant 0 : i32
    return %c0_i32, %c0_i32_0 : i32, i32
  }
  func.func @transform_5(%arg0: i32) -> (i32, i32) {
    %c0_i32 = arith.constant 0 : i32
    %c0_i32_0 = arith.constant 0 : i32
    return %arg0, %c0_i32 : i32, i32
  }
}

</mosaic_0001>

<bundles_post_ra>
// kernel: tpu_custom_call.1
= control target key start
LH: loop header
LB: loop body
LE: loop exit
PB: predicated region body
PF: predicated region fallthrough
CT: control target
= control target key end

     0   :  { %10 = vsyncpa [#allocation3], 0  ;;  %s2222_s0 = inlined_call_operand.hbm [shape: f32[392,128], index: 0, kind: input, shape index: {}]   ;;  %s2223_s1 = inlined_call_operand.hbm [shape: bf16[128,256], index: 1, kind: input, shape index: {}]   ;;  %s2224_s2 = inlined_call_operand.vmem [shape: f32[1,256], index: 2, kind: input, shape index: {}]   ;;  %s2225_s3 = inlined_call_operand.hbm [shape: bf16[256,128], index: 3, kind: input, shape index: {}]   ;;  %s2226_s4 = inlined_call_operand.vmem [shape: f32[1,128], index: 4, kind: input, shape index: {}]   ;;  %s2227_s5 = inlined_call_operand.hbm [shape: f32[392,128], index: 5, kind: output, shape index: {}]  }
   0x1   :  { %12 = vsyncpa [#allocation3 + $0x1], 0 }
   0x2   :  { %13 = vsyncpa [#allocation6], 0 }
   0x3   :  { %14 = vsyncpa [#allocation4], 0 }
   0x4   :  { %16 = vsyncpa [#allocation4 + $0x1], 0  ;;  %s1787_s18 = smov 0   ;;  %s1789_s19 = smov 0  }
   0x5   :  { %s1791_s20 = smov 0   ;;  %s1793_s21 = smov 0  }
   0x6 LB: > { %s1808_s22 = sadd.s32 4294967295, %s1742_s21   ;;  %s1305_s23 = sadd.s32 4294967294, %s1742_s21   ;;  %s1742_s21 = sphi %s1793_s21, %s2249_s21   ;;  %s1738_s20 = sphi %s1791_s20, %s2248_s20   ;;  %s1734_s19 = sphi %s1789_s19, %s2247_s19   ;;  %s1730_s18 = sphi %s1787_s18, %s2246_s18  }
   0x7   : > { %s1812_s24 = sadd.s32 1, %s1742_s21   ;;  %s29_s25 = sadd.s32 1, %s1738_s20 }
   0x8   : > { %s26_s26 = ssub.s32 %s1742_s21, %s1812_s24  ;;  %p36_p0 = scmp.ne.s32.totalorder %s1738_s20, %s1734_s19 }
   0x9   : > { %p27_p1 = scmp.eq.s32.totalorder %s26_s26, 0  ;;  %p37_p2 = scmp.eq.s32.totalorder %s1742_s21, 0 }
   0xa   : > { %p42_p3 = scmp.ne.s32.totalorder %s1734_s19, %s1730_s18  ;;  %p2228_p4 = scmp.eq.s32.totalorder %s1808_s22, 0 }
   0xb   : > { %s1824_s27 = scalar_select %p27_p1, %s1738_s20, %s29_s25  }
   0xc   : > { %p1826_p5 = por %p37_p2, %p36_p0  ;;  %p1832_p6 = por %p2228_p4, %p42_p3 }
   0xd   : > { %2231 = sst [smem:[#allocation12_spill]] %s1824_s27  ;;  %p150_p7 = scmp.eq.s32.totalorder %s1808_s22, 1 }
   0xe   : > { %s2232_s28 = scalar_select %p1826_p5, 1, 0 }
   0xf   : > { %s2233_s29 = scalar_select %p1832_p6, 1, 0 }
  0x10   : > { %p156_p8 = scmp.eq.s32.totalorder %s1305_s23, 1  ;;  %p1306_p9 = scmp.ge.s32.totalorder %s1742_s21, 1 }
  0x11   : > { %p163_p10 = scmp.lt.s32.totalorder %s1742_s21, 3  ;;  %p1839_p11 = por %p150_p7, %p36_p0 }
  0x12   : > { %p1843_p12 = por %p156_p8, %p42_p3  ;;  %s1744_s8 = smov [#allocation5]  }
  0x13   : > { %s2234_s30 = scalar_select %p1839_p11, 1, 0 }
  0x14   : > { %s2235_s6 = scalar_select %p1843_p12, 1, 0 }
  0x15   : > { %p1847_p13 = pnand %p1306_p9, %p163_p10  ;;  %s175_s9 = sshll.u32 %s1744_s8, 4  ;;  %s176_s9 = int_to_ptr.vmem [resolvable:$true] %s175_s9 }
  0x16   : > { %s1745_s11 = smov [#allocation7]   ;;  %s1588_s15 = scalar_lea.hbm %s2223_s1, 2048 }
  0x17   : > { %s2236_s7 = scalar_select %p1847_p13, 1, 0 }
  0x18   : > { %p1466_p1 = pneg %p1847_p13  ;;  %s191_s12 = sshll.u32 %s1745_s11, 4  ;;  %s1859_s12 = int_to_ptr.vmem [resolvable:$true] %s191_s12 }
  0x19   : > { %p1589_p0 = scmp.ne.s32.totalorder %s2223_s1, %s1588_s15  ;;  %p1595_p9 = scmp.lt.u32.totalorder %s1588_s15, %s2223_s1 }
  0x1a   : > { %p1855_p2 = pnand %p1466_p1, %p2228_p4 }
  0x1c   : > { %p1590_p3 = pneg %p1855_p2 }
  0x1e   : > { %p1591_p7 = pnand %p1590_p3, %p1589_p0 }
  0x20   : > { %p1592_p8 = pneg %p1591_p7 }
  0x22   : > { %p1597_p10 = pnand %p1595_p9, %p1592_p8 }
  0x24   : > { %1600 = shalt.err (!%p1597_p10)
}
  0x25   : > { %s1601_s26 = scalar_lea.vmem %s176_s9, 2048  ;;  %p1609_p11 = scmp.lt.s32.totalorder %s176_s9, %s176_s9 }
  0x26   : > { %p1602_p1 = scmp.ne.s32.totalorder %s176_s9, %s1601_s26  ;;  %p1610_p6 = scmp.lt.s32.totalorder %s1601_s26, %s1601_s26 }
  0x28   : > { %p1604_p4 = pnand %p1602_p1, %p1590_p3  ;;  %p1611_p13 = por %p1610_p6, %p1609_p11 }
  0x2a   : > { %p1605_p12 = pneg %p1604_p4 }
  0x2c   : > { %p1612_p5 = pnand %p1611_p13, %p1605_p12 }
  0x2e   : > { %1615 = shalt.err (!%p1612_p5)
}
  0x2f   : > { %s1746_s8 = smov 128   ;;  %s1747_s11 = smov 8  }
  0x30   : > { %1469 = dma.hbm_to_vmem [thread:$0]  (!%p1855_p2), %s2223_s1, 2048, %s176_s9, [#allocation6], %s1746_s8, %s1746_s8, %s1747_s11  }
  0x31   : > { %s1616_s17 = scalar_lea.hbm %s2225_s3, 2048 }
  0x32   : > { %p1617_p4 = scmp.ne.s32.totalorder %s2225_s3, %s1616_s17  ;;  %p1623_p11 = scmp.lt.u32.totalorder %s1616_s17, %s2225_s3 }
  0x34   : > { %p1619_p5 = pnand %p1617_p4, %p1590_p3 }
  0x36   : > { %p1620_p6 = pneg %p1619_p5 }
  0x38   : > { %p1625_p12 = pnand %p1623_p11, %p1620_p6 }
  0x3a   : > { %1628 = shalt.err (!%p1625_p12)
}
  0x3b   : > { %s1629_s9 = scalar_lea.vmem %s1859_s12, 2048  ;;  %p1637_p8 = scmp.lt.s32.totalorder %s1859_s12, %s1859_s12 }
  0x3c   : > { %p1630_p13 = scmp.ne.s32.totalorder %s1859_s12, %s1629_s9  ;;  %p1638_p9 = scmp.lt.s32.totalorder %s1629_s9, %s1629_s9 }
  0x3e   : > { %p1632_p0 = pnand %p1630_p13, %p1590_p3  ;;  %p1639_p10 = por %p1638_p9, %p1637_p8 }
  0x40   : > { %p1633_p7 = pneg %p1632_p0 }
  0x42   : > { %p1640_p1 = pnand %p1639_p10, %p1633_p7 }
  0x44   : > { %1643 = shalt.err (!%p1640_p1)
}
  0x45   : > { %s1748_s27 = smov 64   ;;  %s1749_s8 = smov 4  }
  0x46   : > { %1472 = dma.hbm_to_vmem [thread:$0]  (!%p1855_p2), %s2225_s3, 2048, %s1859_s12, [#allocation6], %s1748_s27, %s1748_s27, %s1749_s8  }
  0x47   : > { %p1309_p4 = scmp.ge.s32.totalorder %s1742_s21, 2 }
  0x48   : > { %p2238_p3 = scmp.ne.s32.totalorder (!%p1309_p4), %s2232_s28, 0 }
  0x49   : > { %204 = sbr.rel (%p1309_p4) target bundleno = 115 (0x73), region = 32 }
  0x50   : > { %207 = sbr.rel (!%p2238_p3) target bundleno = 115 (0x73), region = 36  ;;  %s208_s14 = sand.u32 (%p2238_p3), 1, %s1738_s20  }
  0x51   : > { %s213_s15 = smul.u32 (%p2238_p3), 25, %s1742_s21  ;;  %s1918_s23 = scalar_lea.sflag (%p2238_p3), [#allocation3], %s208_s14 }
  0x52   : > { %s1454_s16 = smul.u32 (%p2238_p3), 200, %s208_s14 }
  0x53   : > { %s214_s17 = ssub.s32 (%p2238_p3), 49, %s213_s15 }
  0x54   : > { %p215_p5 = scmp.lt.s32.totalorder (%p2238_p3), %s214_s17, 25  ;;  %s212_s25 = scalar_lea.vmem (%p2238_p3), [#allocation2], %s1454_s16 }
  0x57   : > { %s2251_s17 = smov (!%p215_p5, %s214_s17), 25 }
  0x58   : > { %s1915_s10 = sshll.u32 %s2251_s17, 7 }
  0x59   : > { %s219_s12 = ssub.s32 3200, %s1915_s10 }
  0x5a   : > { %220 = vsyncadd %s1918_s23, %s219_s12  ;;  %p1311_p2 = scmp.ne.s32.totalorder %s1915_s10, 0  ;;  %s1358_s28 = smul.u32 3200, %s1742_s21 }
  0x5b   : > { %s225_s26 = sshll.u32 %s212_s25, 4  ;;  %s1648_s15 = scalar_lea.hbm %s2222_s0, 6272  ;;  %s1928_s26 = int_to_ptr.vmem [resolvable:$true] %s225_s26 }
  0x5c   : > { %s1926_s8 = scalar_lea.hbm %s2222_s0, %s1358_s28 }
  0x5d   : > { %s1644_s11 = scalar_lea.hbm %s1926_s8, %s1915_s10  ;;  %p1649_p13 = scmp.lt.u32.totalorder %s1926_s8, %s2222_s0 }
  0x5e   : > { %p1645_p6 = scmp.ne.s32.totalorder %s1926_s8, %s1644_s11  ;;  %p1650_p0 = scmp.lt.u32.totalorder %s1648_s15, %s1644_s11 }
  0x5f   : > { %p1652_p8 = scmp.lt.u32.totalorder %s1644_s11, %s1926_s8 }
  0x60   : > { %p1646_p11 = pnand %p1645_p6, %p1311_p2  ;;  %p1651_p7 = por %p1650_p0, %p1649_p13 }
  0x62   : > { %p1647_p12 = pneg %p1646_p11  ;;  %p1653_p9 = por %p1652_p8, %p1651_p7 }
  0x64   : > { %p1654_p10 = pnand %p1653_p9, %p1647_p12 }
  0x66   : > { %1657 = shalt.err (!%p1654_p10)
}
  0x67   : > { %s1658_s12 = scalar_lea.vmem %s1928_s26, %s1915_s10  ;;  %s1750_s25 = smov [#allocation2]  }
  0x68   : > { %p1659_p1 = scmp.ne.s32.totalorder %s1928_s26, %s1658_s12  ;;  %s1662_s28 = sshll.u32 %s1750_s25, 4  ;;  %s1663_s28 = int_to_ptr.vmem [resolvable:$false] %s1662_s28 }
  0x69   : > { %s1664_s9 = scalar_lea.vmem %s1663_s28, 6400  ;;  %p1665_p6 = scmp.lt.s32.totalorder %s1928_s26, %s1663_s28 }
  0x6a   : > { %p1660_p3 = pnand %p1659_p1, %p1311_p2  ;;  %p1666_p11 = scmp.lt.s32.totalorder %s1664_s9, %s1658_s12 }
  0x6c   : > { %p1661_p5 = pneg %p1660_p3  ;;  %p1667_p13 = por %p1666_p11, %p1665_p6 }
  0x6e   : > { %p1668_p0 = pnand %p1667_p13, %p1661_p5 }
  0x70   : > { %1671 = shalt.err (!%p1668_p0)
}
  0x71   : > { %s1751_s27 = smov 128   ;;  %s1752_s11 = smov 8  }
  0x72   : > { %231 = dma.hbm_to_vmem [thread:$0]  (%p1311_p2), %s1926_s8, %s1915_s10, %s1928_s26, %s1918_s23, %s1751_s27, %s1751_s27, %s1752_s11  }
  0x73 PF: > { %p2239_p12 = scmp.ne.s32.totalorder %s2236_s7, 0 }
  0x74   : > { %s1958_s13 = sand.u32 (!%p2239_p12), 1, %s1734_s19   ;;  %p2240_p7 = scmp.ne.s32.totalorder (!%p2239_p12), %s2233_s29, 0 }
  0x75   : > { %237 = sbr.rel (%p2239_p12) target bundleno = 735 (0x2df), region = 40  ;;  %s240_s15 = scalar_lea.sflag (!%p2239_p12), [#allocation3], %s1958_s13 }
  0x76   : > { %s1455_s14 = smul.u32 (!%p2239_p12), 200, %s1958_s13 }
  0x78   : > { %s1964_s16 = scalar_lea.vmem (!%p2239_p12), [#allocation2], %s1455_s14 }
  0x7c   : > { %1717 = dma.done.wait (%p2240_p7), %s240_s15, 3200  }
  0x7d   : > { %1719 = vsyncadd (%p2240_p7), %s240_s15, 4294964096  ;;  %p2241_p2 = scmp.eq.s32.totalorder %s1808_s22, 0 }
  0x7f   : > { %1721 = dma.done.wait (%p2241_p2), [#allocation6], 4096   ;;  %p2242_p8 = pmov %p2241_p2 }
  0x80   : > { %v1753_v0 = vmov 0   ;;  %v1525_v1 = vld [vmem:[#allocation5 + $0x4] ss:$8 sps:$4 sm:$0xff]   ;;  %v1527_v2 = vld [vmem:[#allocation5] ss:$8 sps:$4 sm:$0xff]   ;;  %v1553_v19 = vld [vmem:[#allocation7 + $0x50] sm:$0xff]  }
  0x81   : > { %1723 = vsyncadd (%p2242_p8), [#allocation6], 4294963200  ;;  %467 = vmatprep.mubr.bf16.mxu0 %v1753_v0  ;;  %435 = vmatprep.subr.bf16.mxu0 %v1525_v1  ;;  %v1528_v3 = vld [vmem:[#allocation5 + $0x14] ss:$8 sps:$4 sm:$0xff]   ;;  %v1530_v4 = vld [vmem:[#allocation5 + $0x10] ss:$8 sps:$4 sm:$0xff]  }
  0x82   : > { %436 = vmatpush1.bf16.msra.mxu0 %v1527_v2  ;;  %v1531_v5 = vld [vmem:[#allocation5 + $0x24] ss:$8 sps:$4 sm:$0xff]   ;;  %v1533_v6 = vld [vmem:[#allocation5 + $0x20] ss:$8 sps:$4 sm:$0xff]   ;;  %v1534_v7 = vld [vmem:[#allocation5 + $0x34] ss:$8 sps:$4 sm:$0xff]  }
  0x83   : > { %437 = vmatprep.subr.bf16.mxu0 %v1528_v3  ;;  %v1536_v8 = vld [vmem:[#allocation5 + $0x30] ss:$8 sps:$4 sm:$0xff]   ;;  %v1537_v9 = vld [vmem:[#allocation5 + $0x44] ss:$8 sps:$4 sm:$0xff]   ;;  %v1539_v10 = vld [vmem:[#allocation5 + $0x40] ss:$8 sps:$4 sm:$0xff]  }
  0x84   : > { %v1540_v11 = vld [vmem:[#allocation5 + $0x54] ss:$8 sps:$4 sm:$0xff]   ;;  %v1542_v12 = vld [vmem:[#allocation5 + $0x50] ss:$8 sps:$4 sm:$0xff]   ;;  %v1543_v13 = vld [vmem:[#allocation5 + $0x64] ss:$8 sps:$4 sm:$0xff]  }
  0x85   : > { %v1549_v14 = vld [vmem:[#allocation7 + $0x40] sm:$0xff]   ;;  %v1551_v17 = vld [vmem:[#allocation7 + $0x48] sm:$0xff]   ;;  %v1546_v20 = vld [vmem:[#allocation5 + $0x74] ss:$8 sps:$4 sm:$0xff]   ;;  %s2085_s26 = scalar_lea.vmem [#allocation8], %s1455_s14  ;;  %s1194_s8 = scalar_lea.sflag [#allocation4], %s1958_s13 }
  0x86   : > { %438 = vmatpush1.bf16.msra.mxu0 %v1530_v4  ;;  %v1550_v15 = vld [vmem:[#allocation7] sm:$0xff]   ;;  %1360 = vmatprep.subr.bf16.mxu1 %v1549_v14  ;;  %v1552_v18 = vld [vmem:[#allocation7 + $0x8] sm:$0xff]   ;;  %v1548_v21 = vld [vmem:[#allocation5 + $0x70] ss:$8 sps:$4 sm:$0xff]   ;;  %p2243_p9 = scmp.ne.s32.totalorder %s2234_s30, 0 }
  0x87   : > { %439 = vmatprep.subr.bf16.mxu0 %v1531_v5  ;;  %v1545_v16 = vld [vmem:[#allocation5 + $0x60] ss:$8 sps:$4 sm:$0xff]   ;;  %1361 = vmatpush3.bf16.msra.mxu1 %v1550_v15  ;;  %v289_v22 = vld [vmem:[%s1964_s16] sm:$0xff]  ;;  %s1201_s17 = smul.u32 (%p2243_p9), 25, %s1808_s22 }
  0x88   : > { %1362 = vmatprep.subr.bf16.mxu1 %v1551_v17  ;;  %v290_v23 = vld [vmem:[%s1964_s16 + $0x8] sm:$0xff]  ;;  %v1554_v24 = vld [vmem:[#allocation7 + $0x10] sm:$0xff]   ;;  %v1979_v27 = vld [vmem:[%s1964_s16 + $0x10] sm:$0xff] }
  0x89   : > { %v1555_v25 = vld [vmem:[#allocation7 + $0x58] sm:$0xff]   ;;  %v314_v26 = vpack.c.bf16 %v290_v23, %v289_v22  ;;  %v1982_v28 = vld [vmem:[%s1964_s16 + $0x18] sm:$0xff]  ;;  %v295_v33 = vld [vmem:[%s1964_s16 + $0x30] sm:$0xff]  ;;  %s1202_s12 = ssub.s32 (%p2243_p9), 49, %s1201_s17 }
  0x8a   : > { %440 = vmatpush1.bf16.msra.mxu0 %v1533_v6  ;;  %v315_v29 = vpack.c.bf16 %v1982_v28, %v1979_v27  ;;  %v293_v30 = vld [vmem:[%s1964_s16 + $0x20] sm:$0xff]  ;;  %v294_v31 = vld [vmem:[%s1964_s16 + $0x28] sm:$0xff]  ;;  %v296_v34 = vld [vmem:[%s1964_s16 + $0x38] sm:$0xff]  ;;  %p1203_p10 = scmp.lt.s32.totalorder (%p2243_p9), %s1202_s12, 25 }
  0x8b   : > { %441 = vmatprep.subr.bf16.mxu0 %v1534_v7  ;;  %1363 = vmatpush3.bf16.msra.mxu1 %v1552_v18  ;;  %v316_v32 = vpack.c.bf16 %v294_v31, %v293_v30  ;;  %v317_v35 = vpack.c.bf16 %v296_v34, %v295_v33  ;;  %v297_v36 = vld [vmem:[%s1964_s16 + $0x40] sm:$0xff]  ;;  %v298_v37 = vld [vmem:[%s1964_s16 + $0x48] sm:$0xff]  ;;  %v299_v39 = vld [vmem:[%s1964_s16 + $0x50] sm:$0xff] }
  0x8c   : > { %1364 = vmatprep.subr.bf16.mxu1 %v1553_v19  ;;  %v318_v38 = vpack.c.bf16 %v298_v37, %v297_v36  ;;  %v300_v40 = vld [vmem:[%s1964_s16 + $0x58] sm:$0xff]  ;;  %v301_v42 = vld [vmem:[%s1964_s16 + $0x60] sm:$0xff]  ;;  %v302_v43 = vld [vmem:[%s1964_s16 + $0x68] sm:$0xff] }
  0x8d   : > { %v319_v41 = vpack.c.bf16 %v300_v40, %v299_v39  ;;  %v320_v44 = vpack.c.bf16 %v302_v43, %v301_v42  ;;  %v303_v45 = vld [vmem:[%s1964_s16 + $0x70] sm:$0xff]  ;;  %v304_v46 = vld [vmem:[%s1964_s16 + $0x78] sm:$0xff]  ;;  %v305_v48 = vld [vmem:[%s1964_s16 + $0x80] sm:$0xff] }
  0x8e   : > { %442 = vmatpush1.bf16.msra.mxu0 %v1536_v8  ;;  %v321_v47 = vpack.c.bf16 %v304_v46, %v303_v45  ;;  %v306_v49 = vld [vmem:[%s1964_s16 + $0x88] sm:$0xff]  ;;  %v307_v51 = vld [vmem:[%s1964_s16 + $0x90] sm:$0xff]  ;;  %v308_v52 = vld [vmem:[%s1964_s16 + $0x98] sm:$0xff]  ;;  %v345_v8 = vlaneseq }
  0x8f   : > { %443 = vmatprep.subr.bf16.mxu0 %v1537_v9  ;;  %1365 = vmatpush3.bf16.msra.mxu1 %v1554_v24  ;;  %v322_v50 = vpack.c.bf16 %v306_v49, %v305_v48  ;;  %v323_v53 = vpack.c.bf16 %v308_v52, %v307_v51  ;;  %v309_v54 = vld [vmem:[%s1964_s16 + $0xa0] sm:$0xff]  ;;  %v310_v55 = vld [vmem:[%s1964_s16 + $0xa8] sm:$0xff]  ;;  %v311_v57 = vld [vmem:[%s1964_s16 + $0xb0] sm:$0xff] }
  0x90   : > { %1366 = vmatprep.subr.bf16.mxu1 %v1555_v25  ;;  %v324_v56 = vpack.c.bf16 %v310_v55, %v309_v54  ;;  %v312_v58 = vld [vmem:[%s1964_s16 + $0xb8] sm:$0xff]  ;;  %v1556_v59 = vld [vmem:[#allocation7 + $0x18] sm:$0xff]   ;;  %v1557_v61 = vld [vmem:[#allocation7 + $0x60] sm:$0xff]   ;;  %v346_v9 = vshrl.u32 %v345_v8, 7 }
  0x91   : > { %v325_v60 = vpack.c.bf16 %v312_v58, %v311_v57  ;;  %v1558_v62 = vld [vmem:[#allocation7 + $0x20] sm:$0xff]   ;;  %v1559_v63 = vld [vmem:[#allocation7 + $0x68] sm:$0xff]   ;;  %v313_v1 = vld [vmem:[%s1964_s16 + $0xc0] sm:$0xff] }
  0x92   : > { %444 = vmatpush1.bf16.msra.mxu0 %v1539_v10  ;;  %v1560_v2 = vld [vmem:[#allocation7 + $0x28] sm:$0xff]   ;;  %v326_v3 = vpack.c.bf16 %v313_v1, %v313_v1  ;;  %v1561_v4 = vld [vmem:[#allocation7 + $0x70] sm:$0xff]   ;;  %v1563_v6 = vld [vmem:[#allocation7 + $0x78] sm:$0xff]   ;;  %v347_v10 = vsub.s32 0, %v346_v9 }
  0x93   : > { %445 = vmatprep.subr.bf16.mxu0 %v1540_v11  ;;  %1367 = vmatpush3.bf16.msra.mxu1 %v1556_v59  ;;  %v1562_v5 = vld [vmem:[#allocation7 + $0x30] sm:$0xff]   ;;  %v1564_v7 = vld [vmem:[#allocation7 + $0x38] sm:$0xff]   ;;  %v351_v11 = vsub.s32 1, %v346_v9 }
  0x94   : > { %1368 = vmatprep.subr.bf16.mxu1 %v1557_v61 }
  0x96   : > { %446 = vmatpush1.bf16.msra.mxu0 %v1542_v12 }
  0x97   : > { %447 = vmatprep.subr.bf16.mxu0 %v1543_v13  ;;  %1369 = vmatpush3.bf16.msra.mxu1 %v1558_v62 }
  0x98   : > { %1370 = vmatprep.subr.bf16.mxu1 %v1559_v63 }
  0x9a   : > { %448 = vmatpush1.bf16.msra.mxu0 %v1545_v16 }
  0x9b   : > { %449 = vmatprep.subr.bf16.mxu0 %v1546_v20  ;;  %1371 = vmatpush3.bf16.msra.mxu1 %v1560_v2 }
  0x9c   : > { %1372 = vmatprep.subr.bf16.mxu1 %v1561_v4 }
  0x9e   : > { %450 = vmatpush1.bf16.msra.mxu0 %v1548_v21 }
  0x9f   : > { %1373 = vmatpush3.bf16.msra.mxu1 %v1562_v5 }
  0xa0   : > { %1374 = vmatprep.subr.bf16.mxu1 %v1563_v6 }
  0xa1   : > { %468 = vmatmul.mubr.bf16.vlgmr.msra.gmra.mrb[0].mxu0 %v314_v26 }
  0xa2   : > { %477 = vmatprep.mubr.bf16.mxu0 %v1753_v0 }
  0xa3   : > { %1375 = vmatpush3.bf16.msra.mxu1 %v1564_v7 }
  0xa9   : > { %478 = vmatmul.mubr.bf16.gmra.mrb[4].mxu0 %v315_v29 }
  0xaa   : > { %487 = vmatprep.mubr.bf16.mxu0 %v1753_v0 }
  0xb1   : > { %488 = vmatmul.mubr.bf16.gmra.mrb[8].mxu0 %v316_v32 }
  0xb2   : > { %497 = vmatprep.mubr.bf16.mxu0 %v1753_v0 }
  0xb9   : > { %498 = vmatmul.mubr.bf16.gmra.mrb[12].mxu0 %v317_v35 }
  0xba   : > { %507 = vmatprep.mubr.bf16.mxu0 %v1753_v0 }
  0xc1   : > { %508 = vmatmul.mubr.bf16.gmra.mrb[16].mxu0 %v318_v38 }
  0xc2   : > { %517 = vmatprep.mubr.bf16.mxu0 %v1753_v0 }
  0xc9   : > { %518 = vmatmul.mubr.bf16.gmra.mrb[20].mxu0 %v319_v41 }
  0xca   : > { %527 = vmatprep.mubr.bf16.mxu0 %v1753_v0 }
  0xd1   : > { %528 = vmatmul.mubr.bf16.gmra.mrb[24].mxu0 %v320_v44 }
  0xd2   : > { %537 = vmatprep.mubr.bf16.mxu0 %v1753_v0 }
  0xd9   : > { %538 = vmatmul.mubr.bf16.gmra.mrb[28].mxu0 %v321_v47 }
  0xda   : > { %547 = vmatprep.mubr.bf16.mxu0 %v1753_v0 }
  0xe1   : > { %548 = vmatmul.mubr.bf16.gmra.mrb[32].mxu0 %v322_v50 }
  0xe2   : > { %557 = vmatprep.mubr.bf16.mxu0 %v1753_v0 }
  0xe9   : > { %558 = vmatmul.mubr.bf16.gmra.mrb[36].mxu0 %v323_v53 }
  0xea   : > { %567 = vmatprep.mubr.bf16.mxu0 %v1753_v0 }
  0xf1   : > { %568 = vmatmul.mubr.bf16.gmra.mrb[40].mxu0 %v324_v56 }
  0xf2   : > { %577 = vmatprep.mubr.bf16.mxu0 %v1753_v0 }
  0xf9   : > { %578 = vmatmul.mubr.bf16.gmra.mrb[44].mxu0 %v325_v60 }
  0xfa   : > { %587 = vmatprep.mubr.bf16.mxu0 %v1753_v0  ;;  %v343_v0 = vld [vmem:[%s2224_s2] sm:$0x3] }
  0xfb   : > { %v2021_v12 = vrot.slane %v343_v0, %v347_v10  ;;  %v2023_v13 = vrot.slane %v343_v0, %v351_v11 }
 0x101   : > { %588 = vmatmul.mubr.bf16.gmra.mrb[48].mxu0 %v326_v3 }
 0x174   : > { %v469_v14 = vpop.f32.mrb[0].mxu0 }
 0x175   : > { %v470_v15 = vadd.f32 %v469_v14, %v2021_v12  ;;  %v471_v16 = vpop.f32.mrb[1].mxu0 }
 0x176   : > { %v472_v17 = vadd.f32 %v471_v16, %v2023_v13  ;;  %v473_v18 = vpop.f32.mrb[2].mxu0 }
 0x177   : > { %v596_v19 = vadd.f32 3.0, %v470_v15  ;;  %v474_v20 = vadd.f32 %v473_v18, %v2021_v12  ;;  %v475_v21 = vpop.f32.mrb[3].mxu0 }
 0x178   : > { %v597_v22 = vadd.f32 3.0, %v472_v17  ;;  %v476_v23 = vadd.f32 %v475_v21, %v2023_v13 }
 0x179   : > { %v646_v24 = vmax.f32 %v596_v19, 0.0  ;;  %v598_v25 = vadd.f32 3.0, %v474_v20 }
 0x17a   : > { %v647_v26 = vmax.f32 %v597_v22, 0.0  ;;  %v599_v29 = vadd.f32 3.0, %v476_v23 }
 0x17b   : > { %v696_v30 = vmin.f32 %v646_v24, 6.0  ;;  %v648_v31 = vmax.f32 %v598_v25, 0.0 }
 0x17c   : > { %v697_v32 = vmin.f32 %v647_v26, 6.0  ;;  %v649_v33 = vmax.f32 %v599_v29, 0.0  ;;  %v479_v34 = vpop.f32.mrb[4].mxu0 }
 0x17d   : > { %v746_v35 = vmul.f32 %v696_v30, %v470_v15  ;;  %v698_v36 = vmin.f32 %v648_v31, 6.0  ;;  %v480_v37 = vadd.f32 %v479_v34, %v2021_v12  ;;  %v481_v38 = vpop.f32.mrb[5].mxu0 }
 0x17e   : > { %v699_v39 = vmin.f32 %v649_v33, 6.0  ;;  %v482_v40 = vadd.f32 %v481_v38, %v2023_v13  ;;  %v483_v41 = vpop.f32.mrb[6].mxu0  ;;  %v747_v42 = vmul.f32 %v697_v32, %v472_v17 }
 0x17f   : > { %v748_v43 = vmul.f32 %v698_v36, %v474_v20  ;;  %v600_v44 = vadd.f32 3.0, %v480_v37  ;;  %v484_v45 = vadd.f32 %v483_v41, %v2021_v12  ;;  %v485_v46 = vpop.f32.mrb[7].mxu0  ;;  %v796_v50 = vmul.f32 0.16666667, %v746_v35 }
 0x180   : > { %v601_v47 = vadd.f32 3.0, %v482_v40  ;;  %v486_v48 = vadd.f32 %v485_v46, %v2023_v13  ;;  %v749_v49 = vmul.f32 %v699_v39, %v476_v23  ;;  %v797_v56 = vmul.f32 0.16666667, %v747_v42 }
 0x181   : > { %v798_v51 = vmul.f32 0.16666667, %v748_v43  ;;  %v650_v52 = vmax.f32 %v600_v44, 0.0  ;;  %v602_v53 = vadd.f32 3.0, %v484_v45 }
 0x182   : > { %v651_v54 = vmax.f32 %v601_v47, 0.0  ;;  %v603_v55 = vadd.f32 3.0, %v486_v48  ;;  %v799_v57 = vmul.f32 0.16666667, %v749_v49 }
 0x183   : > { %v700_v58 = vmin.f32 %v650_v52, 6.0  ;;  %v652_v59 = vmax.f32 %v602_v53, 0.0  ;;  %v846_v60 = vpack.c.bf16 %v798_v51, %v796_v50 }
 0x184   : > { %v701_v61 = vmin.f32 %v651_v54, 6.0  ;;  %v653_v62 = vmax.f32 %v603_v55, 0.0  ;;  %v489_v63 = vpop.f32.mrb[8].mxu0  ;;  %v847_v1 = vpack.c.bf16 %v799_v57, %v797_v56 }
 0x185   : > { %v750_v2 = vmul.f32 %v700_v58, %v480_v37  ;;  %v702_v3 = vmin.f32 %v652_v59, 6.0  ;;  %v490_v4 = vadd.f32 %v489_v63, %v2021_v12  ;;  %v491_v5 = vpop.f32.mrb[9].mxu0 }
 0x186   : > { %v751_v6 = vmul.f32 %v701_v61, %v482_v40  ;;  %v703_v7 = vmin.f32 %v653_v62, 6.0  ;;  %v492_v8 = vadd.f32 %v491_v5, %v2023_v13  ;;  %v493_v9 = vpop.f32.mrb[10].mxu0  ;;  %1039 = vmatprep.mubr.bf16.mxu1 %v847_v1 }
 0x187   : > { %v752_v10 = vmul.f32 %v702_v3, %v484_v45  ;;  %v604_v0 = vadd.f32 3.0, %v490_v4  ;;  %v494_v11 = vadd.f32 %v493_v9, %v2021_v12  ;;  %v495_v14 = vpop.f32.mrb[11].mxu0  ;;  %1040 = vmatmul.mubr.bf16.vlgmr.msra.gmra.mrb[0].mxu1 %v846_v60  ;;  %v800_v18 = vmul.f32 0.16666667, %v750_v2 }
 0x188   : > { %v753_v15 = vmul.f32 %v703_v7, %v486_v48  ;;  %v605_v16 = vadd.f32 3.0, %v492_v8  ;;  %v496_v17 = vadd.f32 %v495_v14, %v2023_v13  ;;  %v801_v22 = vmul.f32 0.16666667, %v751_v6 }
 0x189   : > { %v802_v19 = vmul.f32 0.16666667, %v752_v10  ;;  %v654_v20 = vmax.f32 %v604_v0, 0.0  ;;  %v606_v21 = vadd.f32 3.0, %v494_v11 }
 0x18a   : > { %v803_v23 = vmul.f32 0.16666667, %v753_v15  ;;  %v655_v24 = vmax.f32 %v605_v16, 0.0  ;;  %v607_v25 = vadd.f32 3.0, %v496_v17 }
 0x18b   : > { %v704_v26 = vmin.f32 %v654_v20, 6.0  ;;  %v656_v29 = vmax.f32 %v606_v21, 0.0  ;;  %v848_v30 = vpack.c.bf16 %v802_v19, %v800_v18 }
 0x18c   : > { %v705_v31 = vmin.f32 %v655_v24, 6.0  ;;  %v657_v32 = vmax.f32 %v607_v25, 0.0  ;;  %v499_v33 = vpop.f32.mrb[12].mxu0  ;;  %v849_v34 = vpack.c.bf16 %v803_v23, %v801_v22 }
 0x18d   : > { %v754_v35 = vmul.f32 %v704_v26, %v490_v4  ;;  %v706_v36 = vmin.f32 %v656_v29, 6.0  ;;  %v500_v37 = vadd.f32 %v499_v33, %v2021_v12  ;;  %v501_v38 = vpop.f32.mrb[13].mxu0 }
 0x18e   : > { %v755_v39 = vmul.f32 %v705_v31, %v492_v8  ;;  %v707_v40 = vmin.f32 %v657_v32, 6.0  ;;  %v502_v41 = vadd.f32 %v501_v38, %v2023_v13  ;;  %v503_v42 = vpop.f32.mrb[14].mxu0  ;;  %1047 = vmatprep.mubr.bf16.mxu1 %v849_v34 }
 0x18f   : > { %v756_v43 = vmul.f32 %v706_v36, %v494_v11  ;;  %v608_v44 = vadd.f32 3.0, %v500_v37  ;;  %v504_v45 = vadd.f32 %v503_v42, %v2021_v12  ;;  %v505_v46 = vpop.f32.mrb[15].mxu0  ;;  %1048 = vmatmul.mubr.bf16.gmra.mrb[4].mxu1 %v848_v30  ;;  %v804_v50 = vmul.f32 0.16666667, %v754_v35 }
 0x190   : > { %v757_v47 = vmul.f32 %v707_v40, %v496_v17  ;;  %v609_v48 = vadd.f32 3.0, %v502_v41  ;;  %v506_v49 = vadd.f32 %v505_v46, %v2023_v13  ;;  %v805_v54 = vmul.f32 0.16666667, %v755_v39 }
 0x191   : > { %v806_v51 = vmul.f32 0.16666667, %v756_v43  ;;  %v658_v52 = vmax.f32 %v608_v44, 0.0  ;;  %v610_v53 = vadd.f32 3.0, %v504_v45 }
 0x192   : > { %v807_v55 = vmul.f32 0.16666667, %v757_v47  ;;  %v659_v56 = vmax.f32 %v609_v48, 0.0  ;;  %v611_v57 = vadd.f32 3.0, %v506_v49 }
 0x193   : > { %v708_v58 = vmin.f32 %v658_v52, 6.0  ;;  %v660_v59 = vmax.f32 %v610_v53, 0.0  ;;  %v850_v60 = vpack.c.bf16 %v806_v51, %v804_v50 }
 0x194   : > { %v709_v61 = vmin.f32 %v659_v56, 6.0  ;;  %v661_v62 = vmax.f32 %v611_v57, 0.0  ;;  %v509_v63 = vpop.f32.mrb[16].mxu0  ;;  %v851_v1 = vpack.c.bf16 %v807_v55, %v805_v54 }
 0x195   : > { %v758_v2 = vmul.f32 %v708_v58, %v500_v37  ;;  %v710_v3 = vmin.f32 %v660_v59, 6.0  ;;  %v510_v4 = vadd.f32 %v509_v63, %v2021_v12  ;;  %v511_v5 = vpop.f32.mrb[17].mxu0 }
 0x196   : > { %v759_v6 = vmul.f32 %v709_v61, %v502_v41  ;;  %v711_v7 = vmin.f32 %v661_v62, 6.0  ;;  %v512_v8 = vadd.f32 %v511_v5, %v2023_v13  ;;  %v513_v9 = vpop.f32.mrb[18].mxu0  ;;  %1055 = vmatprep.mubr.bf16.mxu1 %v851_v1 }
 0x197   : > { %v760_v10 = vmul.f32 %v710_v3, %v504_v45  ;;  %v612_v0 = vadd.f32 3.0, %v510_v4  ;;  %v514_v11 = vadd.f32 %v513_v9, %v2021_v12  ;;  %v515_v14 = vpop.f32.mrb[19].mxu0  ;;  %1056 = vmatmul.mubr.bf16.gmra.mrb[8].mxu1 %v850_v60  ;;  %v808_v18 = vmul.f32 0.16666667, %v758_v2 }
 0x198   : > { %v761_v15 = vmul.f32 %v711_v7, %v506_v49  ;;  %v613_v16 = vadd.f32 3.0, %v512_v8  ;;  %v516_v17 = vadd.f32 %v515_v14, %v2023_v13  ;;  %v809_v22 = vmul.f32 0.16666667, %v759_v6 }
 0x199   : > { %v810_v19 = vmul.f32 0.16666667, %v760_v10  ;;  %v662_v20 = vmax.f32 %v612_v0, 0.0  ;;  %v614_v21 = vadd.f32 3.0, %v514_v11 }
 0x19a   : > { %v811_v23 = vmul.f32 0.16666667, %v761_v15  ;;  %v663_v24 = vmax.f32 %v613_v16, 0.0  ;;  %v615_v25 = vadd.f32 3.0, %v516_v17 }
 0x19b   : > { %v712_v26 = vmin.f32 %v662_v20, 6.0  ;;  %v664_v29 = vmax.f32 %v614_v21, 0.0  ;;  %v852_v30 = vpack.c.bf16 %v810_v19, %v808_v18 }
 0x19c   : > { %v713_v31 = vmin.f32 %v663_v24, 6.0  ;;  %v665_v32 = vmax.f32 %v615_v25, 0.0  ;;  %v519_v33 = vpop.f32.mrb[20].mxu0  ;;  %v853_v34 = vpack.c.bf16 %v811_v23, %v809_v22 }
 0x19d   : > { %v762_v35 = vmul.f32 %v712_v26, %v510_v4  ;;  %v714_v36 = vmin.f32 %v664_v29, 6.0  ;;  %v520_v37 = vadd.f32 %v519_v33, %v2021_v12  ;;  %v521_v38 = vpop.f32.mrb[21].mxu0 }
 0x19e   : > { %v763_v39 = vmul.f32 %v713_v31, %v512_v8  ;;  %v715_v40 = vmin.f32 %v665_v32, 6.0  ;;  %v522_v41 = vadd.f32 %v521_v38, %v2023_v13  ;;  %v523_v42 = vpop.f32.mrb[22].mxu0  ;;  %1063 = vmatprep.mubr.bf16.mxu1 %v853_v34 }
 0x19f   : > { %v764_v43 = vmul.f32 %v714_v36, %v514_v11  ;;  %v616_v44 = vadd.f32 3.0, %v520_v37  ;;  %v524_v45 = vadd.f32 %v523_v42, %v2021_v12  ;;  %v525_v46 = vpop.f32.mrb[23].mxu0  ;;  %1064 = vmatmul.mubr.bf16.gmra.mrb[12].mxu1 %v852_v30  ;;  %v812_v50 = vmul.f32 0.16666667, %v762_v35 }
 0x1a0   : > { %v765_v47 = vmul.f32 %v715_v40, %v516_v17  ;;  %v617_v48 = vadd.f32 3.0, %v522_v41  ;;  %v526_v49 = vadd.f32 %v525_v46, %v2023_v13  ;;  %v813_v54 = vmul.f32 0.16666667, %v763_v39 }
 0x1a1   : > { %v814_v51 = vmul.f32 0.16666667, %v764_v43  ;;  %v666_v52 = vmax.f32 %v616_v44, 0.0  ;;  %v618_v53 = vadd.f32 3.0, %v524_v45 }
 0x1a2   : > { %v815_v55 = vmul.f32 0.16666667, %v765_v47  ;;  %v667_v56 = vmax.f32 %v617_v48, 0.0  ;;  %v619_v57 = vadd.f32 3.0, %v526_v49 }
 0x1a3   : > { %v716_v58 = vmin.f32 %v666_v52, 6.0  ;;  %v668_v59 = vmax.f32 %v618_v53, 0.0  ;;  %v854_v60 = vpack.c.bf16 %v814_v51, %v812_v50 }
 0x1a4   : > { %v717_v61 = vmin.f32 %v667_v56, 6.0  ;;  %v669_v62 = vmax.f32 %v619_v57, 0.0  ;;  %v529_v63 = vpop.f32.mrb[24].mxu0  ;;  %v855_v1 = vpack.c.bf16 %v815_v55, %v813_v54 }
 0x1a5   : > { %v766_v2 = vmul.f32 %v716_v58, %v520_v37  ;;  %v718_v3 = vmin.f32 %v668_v59, 6.0  ;;  %v530_v4 = vadd.f32 %v529_v63, %v2021_v12  ;;  %v531_v5 = vpop.f32.mrb[25].mxu0 }
 0x1a6   : > { %v767_v6 = vmul.f32 %v717_v61, %v522_v41  ;;  %v719_v7 = vmin.f32 %v669_v62, 6.0  ;;  %v532_v8 = vadd.f32 %v531_v5, %v2023_v13  ;;  %v533_v9 = vpop.f32.mrb[26].mxu0  ;;  %1071 = vmatprep.mubr.bf16.mxu1 %v855_v1 }
 0x1a7   : > { %v768_v10 = vmul.f32 %v718_v3, %v524_v45  ;;  %v620_v0 = vadd.f32 3.0, %v530_v4  ;;  %v534_v11 = vadd.f32 %v533_v9, %v2021_v12  ;;  %v535_v14 = vpop.f32.mrb[27].mxu0  ;;  %1072 = vmatmul.mubr.bf16.gmra.mrb[16].mxu1 %v854_v60  ;;  %v816_v18 = vmul.f32 0.16666667, %v766_v2 }
 0x1a8   : > { %v769_v15 = vmul.f32 %v719_v7, %v526_v49  ;;  %v621_v16 = vadd.f32 3.0, %v532_v8  ;;  %v536_v17 = vadd.f32 %v535_v14, %v2023_v13  ;;  %v817_v22 = vmul.f32 0.16666667, %v767_v6 }
 0x1a9   : > { %v818_v19 = vmul.f32 0.16666667, %v768_v10  ;;  %v670_v20 = vmax.f32 %v620_v0, 0.0  ;;  %v622_v21 = vadd.f32 3.0, %v534_v11 }
 0x1aa   : > { %v819_v23 = vmul.f32 0.16666667, %v769_v15  ;;  %v671_v24 = vmax.f32 %v621_v16, 0.0  ;;  %v623_v25 = vadd.f32 3.0, %v536_v17 }
 0x1ab   : > { %v720_v26 = vmin.f32 %v670_v20, 6.0  ;;  %v672_v29 = vmax.f32 %v622_v21, 0.0  ;;  %v856_v30 = vpack.c.bf16 %v818_v19, %v816_v18 }
 0x1ac   : > { %v721_v31 = vmin.f32 %v671_v24, 6.0  ;;  %v673_v32 = vmax.f32 %v623_v25, 0.0  ;;  %v539_v33 = vpop.f32.mrb[28].mxu0  ;;  %v857_v34 = vpack.c.bf16 %v819_v23, %v817_v22 }
 0x1ad   : > { %v770_v35 = vmul.f32 %v720_v26, %v530_v4  ;;  %v722_v36 = vmin.f32 %v672_v29, 6.0  ;;  %v540_v37 = vadd.f32 %v539_v33, %v2021_v12  ;;  %v541_v38 = vpop.f32.mrb[29].mxu0 }
 0x1ae   : > { %v771_v39 = vmul.f32 %v721_v31, %v532_v8  ;;  %v723_v40 = vmin.f32 %v673_v32, 6.0  ;;  %v542_v41 = vadd.f32 %v541_v38, %v2023_v13  ;;  %v543_v42 = vpop.f32.mrb[30].mxu0  ;;  %1079 = vmatprep.mubr.bf16.mxu1 %v857_v34 }
 0x1af   : > { %v772_v43 = vmul.f32 %v722_v36, %v534_v11  ;;  %v624_v44 = vadd.f32 3.0, %v540_v37  ;;  %v544_v45 = vadd.f32 %v543_v42, %v2021_v12  ;;  %v545_v46 = vpop.f32.mrb[31].mxu0  ;;  %1080 = vmatmul.mubr.bf16.gmra.mrb[20].mxu1 %v856_v30  ;;  %v820_v50 = vmul.f32 0.16666667, %v770_v35 }
 0x1b0   : > { %v773_v47 = vmul.f32 %v723_v40, %v536_v17  ;;  %v625_v48 = vadd.f32 3.0, %v542_v41  ;;  %v546_v49 = vadd.f32 %v545_v46, %v2023_v13  ;;  %v821_v54 = vmul.f32 0.16666667, %v771_v39 }
 0x1b1   : > { %v822_v51 = vmul.f32 0.16666667, %v772_v43  ;;  %v674_v52 = vmax.f32 %v624_v44, 0.0  ;;  %v626_v53 = vadd.f32 3.0, %v544_v45 }
 0x1b2   : > { %v823_v55 = vmul.f32 0.16666667, %v773_v47  ;;  %v675_v56 = vmax.f32 %v625_v48, 0.0  ;;  %v627_v57 = vadd.f32 3.0, %v546_v49 }
 0x1b3   : > { %v724_v58 = vmin.f32 %v674_v52, 6.0  ;;  %v676_v59 = vmax.f32 %v626_v53, 0.0  ;;  %v858_v60 = vpack.c.bf16 %v822_v51, %v820_v50 }
 0x1b4   : > { %v725_v61 = vmin.f32 %v675_v56, 6.0  ;;  %v677_v62 = vmax.f32 %v627_v57, 0.0  ;;  %v549_v63 = vpop.f32.mrb[32].mxu0  ;;  %v859_v1 = vpack.c.bf16 %v823_v55, %v821_v54 }
 0x1b5   : > { %v774_v2 = vmul.f32 %v724_v58, %v540_v37  ;;  %v726_v3 = vmin.f32 %v676_v59, 6.0  ;;  %v550_v4 = vadd.f32 %v549_v63, %v2021_v12  ;;  %v551_v5 = vpop.f32.mrb[33].mxu0 }
 0x1b6   : > { %v775_v6 = vmul.f32 %v725_v61, %v542_v41  ;;  %v727_v7 = vmin.f32 %v677_v62, 6.0  ;;  %v552_v8 = vadd.f32 %v551_v5, %v2023_v13  ;;  %v553_v9 = vpop.f32.mrb[34].mxu0  ;;  %1087 = vmatprep.mubr.bf16.mxu1 %v859_v1 }
 0x1b7   : > { %v776_v10 = vmul.f32 %v726_v3, %v544_v45  ;;  %v628_v0 = vadd.f32 3.0, %v550_v4  ;;  %v554_v11 = vadd.f32 %v553_v9, %v2021_v12  ;;  %v555_v14 = vpop.f32.mrb[35].mxu0  ;;  %1088 = vmatmul.mubr.bf16.gmra.mrb[24].mxu1 %v858_v60  ;;  %v824_v18 = vmul.f32 0.16666667, %v774_v2 }
 0x1b8   : > { %v777_v15 = vmul.f32 %v727_v7, %v546_v49  ;;  %v629_v16 = vadd.f32 3.0, %v552_v8  ;;  %v556_v17 = vadd.f32 %v555_v14, %v2023_v13  ;;  %v825_v22 = vmul.f32 0.16666667, %v775_v6 }
 0x1b9   : > { %v826_v19 = vmul.f32 0.16666667, %v776_v10  ;;  %v678_v20 = vmax.f32 %v628_v0, 0.0  ;;  %v630_v21 = vadd.f32 3.0, %v554_v11 }
 0x1ba   : > { %v827_v23 = vmul.f32 0.16666667, %v777_v15  ;;  %v679_v24 = vmax.f32 %v629_v16, 0.0  ;;  %v631_v25 = vadd.f32 3.0, %v556_v17 }
 0x1bb   : > { %v728_v26 = vmin.f32 %v678_v20, 6.0  ;;  %v680_v29 = vmax.f32 %v630_v21, 0.0  ;;  %v860_v30 = vpack.c.bf16 %v826_v19, %v824_v18 }
 0x1bc   : > { %v729_v31 = vmin.f32 %v679_v24, 6.0  ;;  %v681_v32 = vmax.f32 %v631_v25, 0.0  ;;  %v559_v33 = vpop.f32.mrb[36].mxu0  ;;  %v861_v34 = vpack.c.bf16 %v827_v23, %v825_v22 }
 0x1bd   : > { %v778_v35 = vmul.f32 %v728_v26, %v550_v4  ;;  %v730_v36 = vmin.f32 %v680_v29, 6.0  ;;  %v560_v37 = vadd.f32 %v559_v33, %v2021_v12  ;;  %v561_v38 = vpop.f32.mrb[37].mxu0 }
 0x1be   : > { %v779_v39 = vmul.f32 %v729_v31, %v552_v8  ;;  %v731_v40 = vmin.f32 %v681_v32, 6.0  ;;  %v562_v41 = vadd.f32 %v561_v38, %v2023_v13  ;;  %v563_v42 = vpop.f32.mrb[38].mxu0  ;;  %1095 = vmatprep.mubr.bf16.mxu1 %v861_v34 }
 0x1bf   : > { %v780_v43 = vmul.f32 %v730_v36, %v554_v11  ;;  %v632_v44 = vadd.f32 3.0, %v560_v37  ;;  %v564_v45 = vadd.f32 %v563_v42, %v2021_v12  ;;  %v565_v46 = vpop.f32.mrb[39].mxu0  ;;  %1096 = vmatmul.mubr.bf16.gmra.mrb[28].mxu1 %v860_v30  ;;  %v828_v50 = vmul.f32 0.16666667, %v778_v35 }
 0x1c0   : > { %v781_v47 = vmul.f32 %v731_v40, %v556_v17  ;;  %v633_v48 = vadd.f32 3.0, %v562_v41  ;;  %v566_v49 = vadd.f32 %v565_v46, %v2023_v13  ;;  %v829_v54 = vmul.f32 0.16666667, %v779_v39 }
 0x1c1   : > { %v830_v51 = vmul.f32 0.16666667, %v780_v43  ;;  %v682_v52 = vmax.f32 %v632_v44, 0.0  ;;  %v634_v53 = vadd.f32 3.0, %v564_v45 }
 0x1c2   : > { %v831_v55 = vmul.f32 0.16666667, %v781_v47  ;;  %v683_v56 = vmax.f32 %v633_v48, 0.0  ;;  %v635_v57 = vadd.f32 3.0, %v566_v49 }
 0x1c3   : > { %v732_v58 = vmin.f32 %v682_v52, 6.0  ;;  %v684_v59 = vmax.f32 %v634_v53, 0.0  ;;  %v862_v60 = vpack.c.bf16 %v830_v51, %v828_v50 }
 0x1c4   : > { %v733_v61 = vmin.f32 %v683_v56, 6.0  ;;  %v685_v62 = vmax.f32 %v635_v57, 0.0  ;;  %v569_v63 = vpop.f32.mrb[40].mxu0  ;;  %v863_v1 = vpack.c.bf16 %v831_v55, %v829_v54 }
 0x1c5   : > { %v782_v2 = vmul.f32 %v732_v58, %v560_v37  ;;  %v734_v3 = vmin.f32 %v684_v59, 6.0  ;;  %v570_v4 = vadd.f32 %v569_v63, %v2021_v12  ;;  %v571_v5 = vpop.f32.mrb[41].mxu0 }
 0x1c6   : > { %v783_v6 = vmul.f32 %v733_v61, %v562_v41  ;;  %v735_v7 = vmin.f32 %v685_v62, 6.0  ;;  %v572_v8 = vadd.f32 %v571_v5, %v2023_v13  ;;  %v573_v9 = vpop.f32.mrb[42].mxu0  ;;  %1103 = vmatprep.mubr.bf16.mxu1 %v863_v1 }
 0x1c7   : > { %v784_v10 = vmul.f32 %v734_v3, %v564_v45  ;;  %v636_v0 = vadd.f32 3.0, %v570_v4  ;;  %v574_v11 = vadd.f32 %v573_v9, %v2021_v12  ;;  %v575_v14 = vpop.f32.mrb[43].mxu0  ;;  %1104 = vmatmul.mubr.bf16.gmra.mrb[32].mxu1 %v862_v60  ;;  %v832_v18 = vmul.f32 0.16666667, %v782_v2 }
 0x1c8   : > { %v785_v15 = vmul.f32 %v735_v7, %v566_v49  ;;  %v637_v16 = vadd.f32 3.0, %v572_v8  ;;  %v576_v17 = vadd.f32 %v575_v14, %v2023_v13  ;;  %v833_v22 = vmul.f32 0.16666667, %v783_v6 }
 0x1c9   : > { %v834_v19 = vmul.f32 0.16666667, %v784_v10  ;;  %v686_v20 = vmax.f32 %v636_v0, 0.0  ;;  %v638_v21 = vadd.f32 3.0, %v574_v11 }
 0x1ca   : > { %v835_v23 = vmul.f32 0.16666667, %v785_v15  ;;  %v687_v24 = vmax.f32 %v637_v16, 0.0  ;;  %v639_v25 = vadd.f32 3.0, %v576_v17 }
 0x1cb   : > { %v736_v26 = vmin.f32 %v686_v20, 6.0  ;;  %v688_v29 = vmax.f32 %v638_v21, 0.0  ;;  %v864_v30 = vpack.c.bf16 %v834_v19, %v832_v18 }
 0x1cc   : > { %v737_v31 = vmin.f32 %v687_v24, 6.0  ;;  %v689_v32 = vmax.f32 %v639_v25, 0.0  ;;  %v579_v33 = vpop.f32.mrb[44].mxu0  ;;  %v865_v34 = vpack.c.bf16 %v835_v23, %v833_v22 }
 0x1cd   : > { %v786_v35 = vmul.f32 %v736_v26, %v570_v4  ;;  %v738_v36 = vmin.f32 %v688_v29, 6.0  ;;  %v580_v37 = vadd.f32 %v579_v33, %v2021_v12  ;;  %v581_v38 = vpop.f32.mrb[45].mxu0  ;;  %v2078_v33 = vld [vmem:[%s2226_s4] ss:$0 sm:$0xff] }
 0x1ce   : > { %v787_v39 = vmul.f32 %v737_v31, %v572_v8  ;;  %v739_v40 = vmin.f32 %v689_v32, 6.0  ;;  %v582_v41 = vadd.f32 %v581_v38, %v2023_v13  ;;  %v583_v42 = vpop.f32.mrb[46].mxu0  ;;  %1111 = vmatprep.mubr.bf16.mxu1 %v865_v34 }
 0x1cf   : > { %v788_v43 = vmul.f32 %v738_v36, %v574_v11  ;;  %v640_v44 = vadd.f32 3.0, %v580_v37  ;;  %v584_v45 = vadd.f32 %v583_v42, %v2021_v12  ;;  %v585_v46 = vpop.f32.mrb[47].mxu0  ;;  %1112 = vmatmul.mubr.bf16.gmra.mrb[36].mxu1 %v864_v30  ;;  %v836_v50 = vmul.f32 0.16666667, %v786_v35 }
 0x1d0   : > { %v789_v47 = vmul.f32 %v739_v40, %v576_v17  ;;  %v641_v48 = vadd.f32 3.0, %v582_v41  ;;  %v586_v49 = vadd.f32 %v585_v46, %v2023_v13  ;;  %v837_v54 = vmul.f32 0.16666667, %v787_v39  ;;  %v1565_v40 = vld [vmem:[%s1964_s16] sm:$0xff] }
 0x1d1   : > { %v838_v51 = vmul.f32 0.16666667, %v788_v43  ;;  %v690_v52 = vmax.f32 %v640_v44, 0.0  ;;  %v642_v53 = vadd.f32 3.0, %v584_v45  ;;  %v1566_v43 = vld [vmem:[%s1964_s16 + $0x8] sm:$0xff] }
 0x1d2   : > { %v839_v55 = vmul.f32 0.16666667, %v789_v47  ;;  %v691_v56 = vmax.f32 %v641_v48, 0.0  ;;  %v643_v57 = vadd.f32 3.0, %v586_v49 }
 0x1d3   : > { %v740_v58 = vmin.f32 %v690_v52, 6.0  ;;  %v692_v59 = vmax.f32 %v642_v53, 0.0  ;;  %v866_v60 = vpack.c.bf16 %v838_v51, %v836_v50 }
 0x1d4   : > { %v741_v61 = vmin.f32 %v691_v56, 6.0  ;;  %v693_v62 = vmax.f32 %v643_v57, 0.0  ;;  %v589_v63 = vpop.f32.mrb[48].mxu0  ;;  %v867_v1 = vpack.c.bf16 %v839_v55, %v837_v54 }
 0x1d5   : > { %v790_v2 = vmul.f32 %v740_v58, %v580_v37  ;;  %v742_v3 = vmin.f32 %v692_v59, 6.0  ;;  %v590_v4 = vadd.f32 %v589_v63, %v2021_v12  ;;  %v591_v5 = vpop.f32.mrb[49].mxu0 }
 0x1d6   : > { %v791_v6 = vmul.f32 %v741_v61, %v582_v41  ;;  %v743_v7 = vmin.f32 %v693_v62, 6.0  ;;  %v592_v8 = vadd.f32 %v591_v5, %v2023_v13  ;;  %v593_v9 = vpop.f32.mrb[50].mxu0  ;;  %1119 = vmatprep.mubr.bf16.mxu1 %v867_v1  ;;  %v1567_v62 = vld [vmem:[%s1964_s16 + $0x20] sm:$0xff]  ;;  %v1568_v1 = vld [vmem:[%s1964_s16 + $0x28] sm:$0xff] }
 0x1d7   : > { %v792_v10 = vmul.f32 %v742_v3, %v584_v45  ;;  %v644_v0 = vadd.f32 3.0, %v590_v4  ;;  %v594_v11 = vpop.f32.mrb[51].mxu0  ;;  %1120 = vmatmul.mubr.bf16.gmra.mrb[40].mxu1 %v866_v60  ;;  %v840_v16 = vmul.f32 0.16666667, %v790_v2  ;;  %v1569_v9 = vld [vmem:[%s1964_s16 + $0x30] sm:$0xff] }
 0x1d8   : > { %v793_v14 = vmul.f32 %v743_v7, %v586_v49  ;;  %v645_v15 = vadd.f32 3.0, %v592_v8  ;;  %v841_v19 = vmul.f32 0.16666667, %v791_v6  ;;  %v1570_v11 = vld [vmem:[%s1964_s16 + $0x38] sm:$0xff] }
 0x1d9   : > { %v842_v17 = vmul.f32 0.16666667, %v792_v10  ;;  %v694_v18 = vmax.f32 %v644_v0, 0.0 }
 0x1da   : > { %v843_v20 = vmul.f32 0.16666667, %v793_v14  ;;  %v695_v21 = vmax.f32 %v645_v15, 0.0 }
 0x1db   : > { %v744_v12 = vmin.f32 %v694_v18, 6.0  ;;  %v868_v22 = vpack.c.bf16 %v842_v17, %v840_v16 }
 0x1dc   : > { %v745_v23 = vmin.f32 %v695_v21, 6.0  ;;  %v869_v24 = vpack.c.bf16 %v843_v20, %v841_v19 }
 0x1dd   : > { %v794_v25 = vmul.f32 %v744_v12, %v590_v4  ;;  %v1571_v12 = vld [vmem:[%s1964_s16 + $0x40] sm:$0xff] }
 0x1de   : > { %v795_v13 = vmul.f32 %v745_v23, %v592_v8  ;;  %1127 = vmatprep.mubr.bf16.mxu1 %v869_v24  ;;  %v1572_v24 = vld [vmem:[%s1964_s16 + $0x48] sm:$0xff] }
 0x1df   : > { %1128 = vmatmul.mubr.bf16.gmra.mrb[44].mxu1 %v868_v22  ;;  %v844_v29 = vmul.f32 0.16666667, %v794_v25 }
 0x1e0   : > { %v845_v26 = vmul.f32 0.16666667, %v795_v13 }
 0x1e1   : > { %v870_v31 = vpack.c.bf16 %v844_v29, %v844_v29 }
 0x1e2   : > { %v871_v30 = vpack.c.bf16 %v845_v26, %v845_v26 }
 0x1e4   : > { %1135 = vmatprep.mubr.bf16.mxu1 %v871_v30 }
 0x1e7   : > { %1136 = vmatmul.mubr.bf16.gmra.mrb[48].mxu1 %v870_v31 }
 0x25a   : > { %v1376_v32 = vpop.f32.mrb[0].mxu1 }
 0x25b   : > { %v1377_v34 = vpop.f32.mrb[1].mxu1 }
 0x25c   : > { %v1378_v35 = vadd.f32 %v1377_v34, %v1376_v32  ;;  %v1379_v36 = vpop.f32.mrb[2].mxu1 }
 0x25d   : > { %v1380_v37 = vpop.f32.mrb[3].mxu1 }
 0x25e   : > { %v1042_v38 = vadd.f32 %v1378_v35, %v2078_v33  ;;  %v1381_v39 = vadd.f32 %v1380_v37, %v1379_v36  ;;  %v1573_v35 = vld [vmem:[%s1964_s16 + $0x50] sm:$0xff] }
 0x260   : > { %v1143_v41 = vadd.f32 %v1565_v40, %v1042_v38  ;;  %v1045_v42 = vadd.f32 %v1381_v39, %v2078_v33  ;;  %v1574_v38 = vld [vmem:[%s1964_s16 + $0x58] sm:$0xff] }
 0x262   : > { %1168 = vst [vmem:[%s2085_s26] sm:$0xff] %v1143_v41  ;;  %v1144_v44 = vadd.f32 %v1566_v43, %v1045_v42  ;;  %v1382_v45 = vpop.f32.mrb[4].mxu1 }
 0x263   : > { %v1383_v46 = vpop.f32.mrb[5].mxu1 }
 0x264   : > { %1169 = vst [vmem:[%s2085_s26 + $0x8] sm:$0xff] %v1144_v44  ;;  %v1384_v47 = vadd.f32 %v1383_v46, %v1382_v45  ;;  %v1385_v48 = vpop.f32.mrb[6].mxu1 }
 0x265   : > { %v1386_v49 = vpop.f32.mrb[7].mxu1 }
 0x266   : > { %v1050_v50 = vadd.f32 %v1384_v47, %v2078_v33  ;;  %v1387_v51 = vadd.f32 %v1386_v49, %v1385_v48  ;;  %v1575_v47 = vld [vmem:[%s1964_s16 + $0x60] sm:$0xff] }
 0x268   : > { %v1145_v52 = vadd.f32 %v1050_v50, %v1979_v27  ;;  %v1053_v53 = vadd.f32 %v1387_v51, %v2078_v33  ;;  %v1576_v50 = vld [vmem:[%s1964_s16 + $0x68] sm:$0xff] }
 0x26a   : > { %1170 = vst [vmem:[%s2085_s26 + $0x10] sm:$0xff] %v1145_v52  ;;  %v1146_v54 = vadd.f32 %v1053_v53, %v1982_v28  ;;  %v1388_v55 = vpop.f32.mrb[8].mxu1 }
 0x26b   : > { %v1389_v56 = vpop.f32.mrb[9].mxu1 }
 0x26c   : > { %1171 = vst [vmem:[%s2085_s26 + $0x18] sm:$0xff] %v1146_v54  ;;  %v1390_v57 = vadd.f32 %v1389_v56, %v1388_v55  ;;  %v1391_v58 = vpop.f32.mrb[10].mxu1 }
 0x26d   : > { %v1392_v59 = vpop.f32.mrb[11].mxu1 }
 0x26e   : > { %v1058_v60 = vadd.f32 %v1390_v57, %v2078_v33  ;;  %v1393_v61 = vadd.f32 %v1392_v59, %v1391_v58  ;;  %v1577_v59 = vld [vmem:[%s1964_s16 + $0x70] sm:$0xff] }
 0x270   : > { %v1147_v63 = vadd.f32 %v1567_v62, %v1058_v60  ;;  %v1061_v27 = vadd.f32 %v1393_v61, %v2078_v33  ;;  %v1578_v62 = vld [vmem:[%s1964_s16 + $0x78] sm:$0xff] }
 0x272   : > { %1172 = vst [vmem:[%s2085_s26 + $0x20] sm:$0xff] %v1147_v63  ;;  %v1148_v28 = vadd.f32 %v1568_v1, %v1061_v27  ;;  %v1394_v2 = vpop.f32.mrb[12].mxu1 }
 0x273   : > { %v1395_v3 = vpop.f32.mrb[13].mxu1 }
 0x274   : > { %1173 = vst [vmem:[%s2085_s26 + $0x28] sm:$0xff] %v1148_v28  ;;  %v1396_v4 = vadd.f32 %v1395_v3, %v1394_v2  ;;  %v1397_v5 = vpop.f32.mrb[14].mxu1 }
 0x275   : > { %v1398_v6 = vpop.f32.mrb[15].mxu1 }
 0x276   : > { %v1066_v7 = vadd.f32 %v1396_v4, %v2078_v33  ;;  %v1399_v8 = vadd.f32 %v1398_v6, %v1397_v5  ;;  %v1579_v6 = vld [vmem:[%s1964_s16 + $0x80] sm:$0xff] }
 0x278   : > { %v1149_v10 = vadd.f32 %v1569_v9, %v1066_v7  ;;  %v1069_v0 = vadd.f32 %v1399_v8, %v2078_v33  ;;  %v1580_v9 = vld [vmem:[%s1964_s16 + $0x88] sm:$0xff] }
 0x27a   : > { %1174 = vst [vmem:[%s2085_s26 + $0x30] sm:$0xff] %v1149_v10  ;;  %v1150_v14 = vadd.f32 %v1570_v11, %v1069_v0  ;;  %v1400_v15 = vpop.f32.mrb[16].mxu1 }
 0x27b   : > { %v1401_v16 = vpop.f32.mrb[17].mxu1 }
 0x27c   : > { %1175 = vst [vmem:[%s2085_s26 + $0x38] sm:$0xff] %v1150_v14  ;;  %v1402_v17 = vadd.f32 %v1401_v16, %v1400_v15  ;;  %v1403_v18 = vpop.f32.mrb[18].mxu1 }
 0x27d   : > { %v1404_v19 = vpop.f32.mrb[19].mxu1 }
 0x27e   : > { %v1074_v20 = vadd.f32 %v1402_v17, %v2078_v33  ;;  %v1405_v21 = vadd.f32 %v1404_v19, %v1403_v18  ;;  %v1581_v19 = vld [vmem:[%s1964_s16 + $0x90] sm:$0xff] }
 0x280   : > { %v1151_v22 = vadd.f32 %v1571_v12, %v1074_v20  ;;  %v1077_v23 = vadd.f32 %v1405_v21, %v2078_v33  ;;  %v1582_v12 = vld [vmem:[%s1964_s16 + $0x98] sm:$0xff] }
 0x282   : > { %1176 = vst [vmem:[%s2085_s26 + $0x40] sm:$0xff] %v1151_v22  ;;  %v1152_v25 = vadd.f32 %v1572_v24, %v1077_v23  ;;  %v1406_v13 = vpop.f32.mrb[20].mxu1 }
 0x283   : > { %v1407_v26 = vpop.f32.mrb[21].mxu1 }
 0x284   : > { %1177 = vst [vmem:[%s2085_s26 + $0x48] sm:$0xff] %v1152_v25  ;;  %v1408_v29 = vadd.f32 %v1407_v26, %v1406_v13  ;;  %v1409_v30 = vpop.f32.mrb[22].mxu1 }
 0x285   : > { %v1410_v31 = vpop.f32.mrb[23].mxu1 }
 0x286   : > { %v1082_v32 = vadd.f32 %v1408_v29, %v2078_v33  ;;  %v1411_v34 = vadd.f32 %v1410_v31, %v1409_v30  ;;  %v1583_v31 = vld [vmem:[%s1964_s16 + $0xa0] sm:$0xff] }
 0x288   : > { %v1153_v36 = vadd.f32 %v1573_v35, %v1082_v32  ;;  %v1085_v37 = vadd.f32 %v1411_v34, %v2078_v33  ;;  %v1584_v35 = vld [vmem:[%s1964_s16 + $0xa8] sm:$0xff] }
 0x28a   : > { %1178 = vst [vmem:[%s2085_s26 + $0x50] sm:$0xff] %v1153_v36  ;;  %v1154_v39 = vadd.f32 %v1574_v38, %v1085_v37  ;;  %v1412_v40 = vpop.f32.mrb[24].mxu1 }
 0x28b   : > { %v1413_v41 = vpop.f32.mrb[25].mxu1 }
 0x28c   : > { %1179 = vst [vmem:[%s2085_s26 + $0x58] sm:$0xff] %v1154_v39  ;;  %v1414_v42 = vadd.f32 %v1413_v41, %v1412_v40  ;;  %v1415_v43 = vpop.f32.mrb[26].mxu1 }
 0x28d   : > { %v1416_v44 = vpop.f32.mrb[27].mxu1 }
 0x28e   : > { %v1090_v45 = vadd.f32 %v1414_v42, %v2078_v33  ;;  %v1417_v46 = vadd.f32 %v1416_v44, %v1415_v43  ;;  %v1585_v44 = vld [vmem:[%s1964_s16 + $0xb0] sm:$0xff] }
 0x290   : > { %v1155_v48 = vadd.f32 %v1575_v47, %v1090_v45  ;;  %v1093_v49 = vadd.f32 %v1417_v46, %v2078_v33  ;;  %v1586_v47 = vld [vmem:[%s1964_s16 + $0xb8] sm:$0xff] }
 0x292   : > { %1180 = vst [vmem:[%s2085_s26 + $0x60] sm:$0xff] %v1155_v48  ;;  %v1156_v51 = vadd.f32 %v1576_v50, %v1093_v49  ;;  %v1418_v52 = vpop.f32.mrb[28].mxu1 }
 0x293   : > { %v1419_v53 = vpop.f32.mrb[29].mxu1 }
 0x294   : > { %1181 = vst [vmem:[%s2085_s26 + $0x68] sm:$0xff] %v1156_v51  ;;  %v1420_v54 = vadd.f32 %v1419_v53, %v1418_v52  ;;  %v1421_v55 = vpop.f32.mrb[30].mxu1 }
 0x295   : > { %v1422_v56 = vpop.f32.mrb[31].mxu1 }
 0x296   : > { %v1098_v57 = vadd.f32 %v1420_v54, %v2078_v33  ;;  %v1423_v58 = vadd.f32 %v1422_v56, %v1421_v55  ;;  %v1587_v55 = vld [vmem:[%s1964_s16 + $0xc0] sm:$0xff] }
 0x298   : > { %v1157_v60 = vadd.f32 %v1577_v59, %v1098_v57  ;;  %v1101_v61 = vadd.f32 %v1423_v58, %v2078_v33 }
 0x29a   : > { %1182 = vst [vmem:[%s2085_s26 + $0x70] sm:$0xff] %v1157_v60  ;;  %v1158_v63 = vadd.f32 %v1578_v62, %v1101_v61  ;;  %v1424_v27 = vpop.f32.mrb[32].mxu1 }
 0x29b   : > { %v1425_v1 = vpop.f32.mrb[33].mxu1 }
 0x29c   : > { %1183 = vst [vmem:[%s2085_s26 + $0x78] sm:$0xff] %v1158_v63  ;;  %v1426_v28 = vadd.f32 %v1425_v1, %v1424_v27  ;;  %v1427_v2 = vpop.f32.mrb[34].mxu1 }
 0x29d   : > { %v1428_v3 = vpop.f32.mrb[35].mxu1 }
 0x29e   : > { %v1106_v4 = vadd.f32 %v1426_v28, %v2078_v33  ;;  %v1429_v5 = vadd.f32 %v1428_v3, %v1427_v2 }
 0x2a0   : > { %v1159_v7 = vadd.f32 %v1579_v6, %v1106_v4  ;;  %v1109_v8 = vadd.f32 %v1429_v5, %v2078_v33 }
 0x2a2   : > { %1184 = vst [vmem:[%s2085_s26 + $0x80] sm:$0xff] %v1159_v7  ;;  %v1160_v10 = vadd.f32 %v1580_v9, %v1109_v8  ;;  %v1430_v0 = vpop.f32.mrb[36].mxu1 }
 0x2a3   : > { %v1431_v11 = vpop.f32.mrb[37].mxu1 }
 0x2a4   : > { %1185 = vst [vmem:[%s2085_s26 + $0x88] sm:$0xff] %v1160_v10  ;;  %v1432_v14 = vadd.f32 %v1431_v11, %v1430_v0  ;;  %v1433_v15 = vpop.f32.mrb[38].mxu1 }
 0x2a5   : > { %v1434_v16 = vpop.f32.mrb[39].mxu1 }
 0x2a6   : > { %v1114_v17 = vadd.f32 %v1432_v14, %v2078_v33  ;;  %v1435_v18 = vadd.f32 %v1434_v16, %v1433_v15 }
 0x2a8   : > { %v1161_v20 = vadd.f32 %v1581_v19, %v1114_v17  ;;  %v1117_v21 = vadd.f32 %v1435_v18, %v2078_v33 }
 0x2aa   : > { %1186 = vst [vmem:[%s2085_s26 + $0x90] sm:$0xff] %v1161_v20  ;;  %v1162_v22 = vadd.f32 %v1582_v12, %v1117_v21  ;;  %v1436_v23 = vpop.f32.mrb[40].mxu1 }
 0x2ab   : > { %v1437_v24 = vpop.f32.mrb[41].mxu1 }
 0x2ac   : > { %1187 = vst [vmem:[%s2085_s26 + $0x98] sm:$0xff] %v1162_v22  ;;  %v1438_v25 = vadd.f32 %v1437_v24, %v1436_v23  ;;  %v1439_v13 = vpop.f32.mrb[42].mxu1 }
 0x2ad   : > { %v1440_v26 = vpop.f32.mrb[43].mxu1 }
 0x2ae   : > { %v1122_v29 = vadd.f32 %v1438_v25, %v2078_v33  ;;  %v1441_v30 = vadd.f32 %v1440_v26, %v1439_v13 }
 0x2b0   : > { %v1163_v32 = vadd.f32 %v1583_v31, %v1122_v29  ;;  %v1125_v34 = vadd.f32 %v1441_v30, %v2078_v33 }
 0x2b2   : > { %1188 = vst [vmem:[%s2085_s26 + $0xa0] sm:$0xff] %v1163_v32  ;;  %v1164_v36 = vadd.f32 %v1584_v35, %v1125_v34  ;;  %v1442_v37 = vpop.f32.mrb[44].mxu1 }
 0x2b3   : > { %v1443_v38 = vpop.f32.mrb[45].mxu1 }
 0x2b4   : > { %1189 = vst [vmem:[%s2085_s26 + $0xa8] sm:$0xff] %v1164_v36  ;;  %v1444_v39 = vadd.f32 %v1443_v38, %v1442_v37  ;;  %v1445_v40 = vpop.f32.mrb[46].mxu1 }
 0x2b5   : > { %v1446_v41 = vpop.f32.mrb[47].mxu1 }
 0x2b6   : > { %v1130_v42 = vadd.f32 %v1444_v39, %v2078_v33  ;;  %v1447_v43 = vadd.f32 %v1446_v41, %v1445_v40 }
 0x2b8   : > { %v1165_v45 = vadd.f32 %v1585_v44, %v1130_v42  ;;  %v1133_v46 = vadd.f32 %v1447_v43, %v2078_v33 }
 0x2ba   : > { %1190 = vst [vmem:[%s2085_s26 + $0xb0] sm:$0xff] %v1165_v45  ;;  %v1166_v48 = vadd.f32 %v1586_v47, %v1133_v46  ;;  %v1448_v49 = vpop.f32.mrb[48].mxu1 }
 0x2bb   : > { %v1449_v50 = vpop.f32.mrb[49].mxu1 }
 0x2bc   : > { %1191 = vst [vmem:[%s2085_s26 + $0xb8] sm:$0xff] %v1166_v48  ;;  %v1450_v51 = vadd.f32 %v1449_v50, %v1448_v49  ;;  %v1451_v52 = vpop.f32.mrb[50].mxu1  ;;  %1200 = sbr.rel (!%p2243_p9) target bundleno = 735 (0x2df), region = 56 }
 0x2bd   : > { %v1452_v53 = vpop.f32.mrb[51].mxu1 }
 0x2be   : > { %v1138_v54 = vadd.f32 %v1450_v51, %v2078_v33 }
 0x2c0   : > { %v1167_v56 = vadd.f32 %v1587_v55, %v1138_v54 }
 0x2c2   : > { %1192 = vst [vmem:[%s2085_s26 + $0xc0] sm:$0xff] %v1167_v56 }
 0x2c3   : > { %s2253_s12 = smov (!%p1203_p10, %s1202_s12), 25 }
 0x2c4   : > { %s2163_s25 = sshll.u32 %s2253_s12, 7 }
 0x2c5   : > { %s1207_s28 = ssub.s32 3200, %s2163_s25 }
 0x2c6   : > { %1208 = vsyncadd %s1194_s8, %s1207_s28  ;;  %p1352_p1 = scmp.ne.s32.totalorder %s2163_s25, 0  ;;  %s1359_s30 = smul.u32 3200, %s1808_s22 }
 0x2c7   : > { %s1213_s9 = sshll.u32 %s2085_s26, 4  ;;  %s1754_s16 = smov [#allocation8]   ;;  %s2176_s9 = int_to_ptr.vmem [resolvable:$true] %s1213_s9 }
 0x2c8   : > { %s2174_s14 = scalar_lea.hbm %s2227_s5, %s1359_s30  ;;  %s1672_s15 = scalar_lea.vmem %s2176_s9, %s2163_s25 }
 0x2c9   : > { %p1673_p3 = scmp.ne.s32.totalorder %s2176_s9, %s1672_s15  ;;  %s1676_s29 = sshll.u32 %s1754_s16, 4  ;;  %s1677_s29 = int_to_ptr.vmem [resolvable:$false] %s1676_s29 }
 0x2ca   : > { %s1678_s22 = scalar_lea.vmem %s1677_s29, 6400  ;;  %p1679_p11 = scmp.lt.s32.totalorder %s2176_s9, %s1677_s29 }
 0x2cb   : > { %p1674_p5 = pnand %p1673_p3, %p1352_p1  ;;  %p1680_p13 = scmp.lt.s32.totalorder %s1678_s22, %s1672_s15 }
 0x2cd   : > { %p1675_p6 = pneg %p1674_p5  ;;  %p1681_p0 = por %p1680_p13, %p1679_p11 }
 0x2cf   : > { %p1682_p12 = pnand %p1681_p0, %p1675_p6 }
 0x2d1   : > { %1685 = shalt.err (!%p1682_p12)
}
 0x2d2   : > { %s1686_s7 = scalar_lea.hbm %s2174_s14, %s2163_s25  ;;  %s1690_s26 = scalar_lea.hbm %s2227_s5, 6272 }
 0x2d3   : > { %p1687_p7 = scmp.ne.s32.totalorder %s2174_s14, %s1686_s7  ;;  %p1691_p9 = scmp.lt.u32.totalorder %s2174_s14, %s2227_s5 }
 0x2d4   : > { %p1692_p10 = scmp.lt.u32.totalorder %s1690_s26, %s1686_s7  ;;  %p1694_p5 = scmp.lt.u32.totalorder %s1686_s7, %s2174_s14 }
 0x2d5   : > { %p1688_p2 = pnand %p1687_p7, %p1352_p1 }
 0x2d6   : > { %p1693_p3 = por %p1692_p10, %p1691_p9 }
 0x2d7   : > { %p1689_p8 = pneg %p1688_p2 }
 0x2d8   : > { %p1695_p6 = por %p1694_p5, %p1693_p3 }
 0x2da   : > { %p1696_p11 = pnand %p1695_p6, %p1689_p8 }
 0x2dc   : > { %1699 = shalt.err (!%p1696_p11)
}
 0x2dd   : > { %s1755_s28 = smov 128   ;;  %s1756_s30 = smov 8  }
 0x2de   : > { %1219 = dma.vmem_to_hbm [thread:$0]  (%p1352_p1), %s2176_s9, %s2163_s25, %s2174_s14, %s1194_s8, %s1755_s28, %s1755_s28, %s1756_s30  }
 0x2df PF: > { %s1228_s27 = sand.u32 1, %s1730_s18   ;;  %p2244_p13 = scmp.ne.s32.totalorder %s2235_s6, 0 }
 0x2e0   : > { %s1229_s11 = scalar_lea.sflag [#allocation4], %s1228_s27 }
 0x2e1   : > { %p1474_p0 = pnand %p1309_p4, %p2244_p13 }
 0x2e3   : > { %1725 = dma.done.wait (!%p1474_p0), %s1229_s11, 3200  }
 0x2e4   : > { %1727 = vsyncadd (!%p1474_p0), %s1229_s11, 4294964096  ;;  %s2245_s15 = sld [smem:[#allocation12_spill]]  ;;  %p19_p12 = scmp.ge.s32.totalorder %s1812_s24, 4  }
 0x2e5   : > { %s2246_s18 = smov %s1734_s19  ;;  %s2247_s19 = smov %s1738_s20 }
 0x2e6   : > { %s2249_s21 = smov %s1812_s24  ;;  %21 = sbr.rel (!%p19_p12) target bundleno = 6 (0x6), region = 93 }
 0x2ea   : > { %s2248_s20 = smov %s2245_s15 }
 0x2ed   :  { %1234 = vsyncpa [#allocation3], 1 }
 0x2ee   :  { %1236 = vsyncpa [#allocation3 + $0x1], 1 }
 0x2ef   :  { %1237 = vsyncpa [#allocation6], 1 }
 0x2f0   :  { %1238 = vsyncpa [#allocation4], 1 }
 0x2f1   :  { %1240 = vsyncpa [#allocation4 + $0x1], 1 }

</bundles_post_ra>
